<compile_context>
chip_gen: v7x
topology: tpu7x:2x2x1
jax: 0.10.0
libtpu: 0.0.40
codegen_flags: <defaults>
</compile_context>

<pallas_src>
import numpy as np
import jax
import jax.numpy as jnp
from jax.experimental import pallas as pl
from jax.experimental.pallas import tpu as pltpu


def _dft_kernel(z_ref, w_ref, out_ref):
    """One grid step computes `tile_k` output frequency bins with one matmul.

    z_ref   : (2, 2N)        row 0 = [re | im], row 1 = [im | -re]
    w_ref   : (2N, tile_k)   [cos(2*pi*n*k/N) ; sin(2*pi*n*k/N)] for this k-tile
    out_ref : (2, tile_k)    row 0 = Re(Z[k]), row 1 = Im(Z[k])
    """
    out_ref[...] = jnp.dot(z_ref[...], w_ref[...],
                           preferred_element_type=jnp.float32)


def fft_layer_forward(signal, length=1, sample_rate=256, tile_k=128):
    """Pallas equivalent of fftLayer.forward.

    signal : 1-D f32 audio samples (at least sample_rate*length long)
    returns: (N, 2) f32 array with [:, 0]=real, [:, 1]=imag of the forward DFT
             of z[n] = t[n] + i*signal[n],  t[n] = n / sample_rate.
    """
    n = int(sample_rate * length)
    n_k_pad = tile_k * ((n + tile_k - 1) // tile_k)   # pad frequency axis to tile multiple

    # Time ramp matching torch.arange(0, len, 1/sampleRate) for the used range.
    t = jnp.arange(n, dtype=jnp.float32) / jnp.float32(sample_rate)
    x = signal[:n].astype(jnp.float32)

    # Packed LHS so Re/Im of the DFT drop out of a single MXU matmul:
    #   Z[k] = sum_n (t + i*x) * (cos - i*sin)
    #   Re(Z) = t@cos + x@sin ;  Im(Z) = x@cos - t@sin
    z2 = jnp.stack([jnp.concatenate([t, x]),
                    jnp.concatenate([x, -t])], axis=0)               # (2, 2N)

    # Twiddles built at trace time (HLO constants).  Exact int64 modular
    # arithmetic -> no n*k overflow / phase blow-up even for large N.
    nn = np.arange(n, dtype=np.int64)[:, None]
    kk = np.arange(n_k_pad, dtype=np.int64)[None, :]
    phase = (2.0 * np.pi / n) * ((nn * kk) % n).astype(np.float64)
    w = np.concatenate([np.cos(phase), np.sin(phase)], axis=0)       # (2N, Kpad)
    w = jnp.asarray(w.astype(np.float32))

    cost = pl.CostEstimate(
        flops=2 * 2 * (2 * n) * n_k_pad,                  # one (2,2N)x(2N,Kpad) matmul
        transcendentals=0,                                # no in-kernel cos/sin
        bytes_accessed=(2 * 2 * n + 2 * n * n_k_pad + 2 * n_k_pad) * 4,
    )

    out = pl.pallas_call(
        _dft_kernel,
        out_shape=jax.ShapeDtypeStruct((2, n_k_pad), jnp.float32),
        grid=(n_k_pad // tile_k,),
        in_specs=[
            pl.BlockSpec((2, 2 * n), lambda j: (0, 0)),        # packed signal, resident
            pl.BlockSpec((2 * n, tile_k), lambda j: (0, j)),   # packed twiddle k-tile
        ],
        out_specs=pl.BlockSpec((2, tile_k), lambda j: (0, j)),  # lane-dense output tile
        compiler_params=pltpu.CompilerParams(dimension_semantics=("parallel",)),
        cost_estimate=cost,
    )(z2, w)

    # Drop padded frequency bins; transpose once to torch-style (N, 2) [real, imag].
    return out[:, :n].T


if __name__ == "__main__":
    # Small deterministic setup consistent with the module's forward
    # (sampleRate scaled down 44100 -> 256 so the DFT stays tiny).
    sample_rate = 256
    length = 1
    n = sample_rate * length

    key = jax.random.PRNGKey(0)
    signal = jax.random.normal(key, (2 * n,), dtype=jnp.float32)  # longer than needed; forward slices [:N]

    out = fft_layer_forward(signal, length=length, sample_rate=sample_rate)
    out = jax.block_until_ready(out)

    # Reference check against jnp.fft.fft on the same complex signal.
    t = jnp.arange(n, dtype=jnp.float32) / jnp.float32(sample_rate)
    ref = jnp.fft.fft(t.astype(jnp.complex64) + 1j * signal[:n].astype(jnp.complex64))
    ref_stacked = jnp.stack([ref.real, ref.imag], axis=1)
    assert out.shape == (n, 2)
    assert jnp.allclose(out, ref_stacked, rtol=1e-3, atol=5e-2), "DFT mismatch vs jnp.fft.fft"

    print("KERNEL_OK")
</pallas_src>

<mosaic_0001>
module attributes {stable_mosaic.version = 11 : i64} {
  func.func @_dft_kernel(%arg0: i32, %arg1: memref<2x512xf32, #tpu.memory_space<vmem>>, %arg2: memref<512x128xf32, #tpu.memory_space<vmem>>, %arg3: memref<2x128xf32, #tpu.memory_space<vmem>>) attributes {dimension_semantics = [#tpu.dimension_semantics<parallel>], iteration_bounds = array<i64: 2>, scalar_prefetch = 0 : i64, scratch_operands = 0 : i64, tpu.core_type = #tpu.core_type<tc>, window_params = [{pipeline_mode = #tpu.pipeline_mode<synchronous>, transform_indices = @transform_0, window_bounds = array<i64: 2, 512>}, {transform_indices = @transform_1, window_bounds = array<i64: 512, 128>}, {transform_indices = @transform_2, window_bounds = array<i64: 2, 128>}]} {
    %c0 = arith.constant 0 : index
    %c0_0 = arith.constant 0 : index
    %0 = vector.load %arg1[%c0, %c0_0] : memref<2x512xf32, #tpu.memory_space<vmem>>, vector<2x512xf32>
    %c0_1 = arith.constant 0 : index
    %c0_2 = arith.constant 0 : index
    %1 = vector.load %arg2[%c0_1, %c0_2] : memref<512x128xf32, #tpu.memory_space<vmem>>, vector<512x128xf32>
    %cst = arith.constant dense<0.000000e+00> : vector<2x128xf32>
    %2 = tpu.matmul %0, %1, %cst {dimension_numbers = #tpu.dot_dimension_numbers<[1], [0], [0], [1], [0, 0, 1, 1], [], []>} : vector<2x512xf32>, vector<512x128xf32>, vector<2x128xf32> -> vector<2x128xf32>
    %c0_3 = arith.constant 0 : index
    %c0_4 = arith.constant 0 : index
    %3 = vector.load %arg3[%c0_3, %c0_4] : memref<2x128xf32, #tpu.memory_space<vmem>>, vector<2x128xf32>
    tpu.vector_store %arg3[%c0_3, %c0_4], %2 {strides = array<i32>} : memref<2x128xf32, #tpu.memory_space<vmem>>, vector<2x128xf32>,
    return
  }
  func.func @transform_0(%arg0: i32) -> (i32, i32) {
    %c0_i32 = arith.constant 0 : i32
    %c0_i32_0 = arith.constant 0 : i32
    %c0_i32_1 = arith.constant 0 : i32
    return %c0_i32, %c0_i32_0 : i32, i32
  }
  func.func @transform_1(%arg0: i32) -> (i32, i32) {
    %c0_i32 = arith.constant 0 : i32
    %c0_i32_0 = arith.constant 0 : i32
    return %c0_i32, %arg0 : i32, i32
  }
  func.func @transform_2(%arg0: i32) -> (i32, i32) {
    %c0_i32 = arith.constant 0 : i32
    %c0_i32_0 = arith.constant 0 : i32
    return %c0_i32, %arg0 : i32, i32
  }
}

</mosaic_0001>

<bundles_post_ra>
// kernel: tpu_custom_call.1
= control target key start
LH: loop header
LB: loop body
LE: loop exit
PB: predicated region body
PF: predicated region fallthrough
CT: control target
= control target key end

     0   :  { %7 = vsyncpa [#allocation3], 0  ;;  %s1123_s0 = inlined_call_operand.hbm [shape: f32[2,512], index: 0, kind: input, shape index: {}]   ;;  %s1124_s1 = inlined_call_operand.hbm [shape: f32[512,256], index: 1, kind: input, shape index: {}]   ;;  %s1125_s2 = inlined_call_operand.hbm [shape: f32[2,256], index: 2, kind: output, shape index: {}]  }
   0x1   :  { %8 = vsyncpa [#allocation6], 0 }
   0x2   :  { %10 = vsyncpa [#allocation6 + $0x1], 0 }
   0x3   :  { %11 = vsyncpa [#allocation4], 0 }
   0x4   :  { %13 = vsyncpa [#allocation4 + $0x1], 0  ;;  %s860_s9 = smov 0   ;;  %s862_s10 = smov 0  }
   0x5   :  { %s864_s11 = smov 0   ;;  %s866_s12 = smov 0  }
   0x6 LB: > { %s881_s13 = sadd.s32 4294967295, %s836_s12   ;;  %s498_s14 = sadd.s32 4294967294, %s836_s12   ;;  %s836_s12 = sphi %s866_s12, %s1150_s12   ;;  %s832_s11 = sphi %s864_s11, %s1149_s11   ;;  %s828_s10 = sphi %s862_s10, %s1148_s10   ;;  %s824_s9 = sphi %s860_s9, %s1147_s9  }
   0x7   : > { %s885_s15 = sadd.s32 1, %s836_s12   ;;  %s47_s16 = sadd.s32 1, %s832_s11 }
   0x8   : > { %s44_s17 = ssub.s32 %s836_s12, %s885_s15  ;;  %p54_p0 = scmp.ne.s32.totalorder %s832_s11, %s828_s10 }
   0x9   : > { %p45_p1 = scmp.eq.s32.totalorder %s44_s17, 0  ;;  %p55_p2 = scmp.eq.s32.totalorder %s836_s12, 0 }
   0xa   : > { %p60_p3 = scmp.ne.s32.totalorder %s828_s10, %s824_s9  ;;  %p1126_p4 = scmp.eq.s32.totalorder %s881_s13, 0 }
   0xb   : > { %s897_s18 = scalar_select %p45_p1, %s832_s11, %s47_s16  }
   0xc   : > { %p899_p5 = por %p55_p2, %p54_p0  ;;  %p905_p6 = por %p1126_p4, %p60_p3 }
   0xd   : > { %p84_p7 = scmp.eq.s32.totalorder %s881_s13, 1  ;;  %p90_p8 = scmp.eq.s32.totalorder %s498_s14, 1 }
   0xe   : > { %s1132_s20 = scalar_select %p905_p6, 1, 0 }
   0xf   : > { %p499_p9 = scmp.ge.s32.totalorder %s836_s12, 1  ;;  %p97_p10 = scmp.lt.s32.totalorder %s836_s12, 3 }
  0x10   : > { %p912_p11 = por %p84_p7, %p54_p0  ;;  %p916_p12 = por %p90_p8, %p60_p3 }
  0x11   : > { %p920_p13 = pnand %p499_p9, %p97_p10  ;;  %s838_s24 = smov [#allocation2]  }
  0x12   : > { %s1133_s21 = scalar_select %p912_p11, 1, 0 }
  0x13   : > { %s1134_s22 = scalar_select %p916_p12, 1, 0 }
  0x14   : > { %s1135_s23 = scalar_select %p920_p13, 1, 0 }
  0x15   : > { %p654_p2 = pneg %p920_p13  ;;  %s110_s25 = sshll.u32 %s838_s24, 4  ;;  %s111_s25 = int_to_ptr.vmem [resolvable:$true] %s110_s25 }
  0x16   : > { %p667_p4 = scmp.lt.s32.totalorder %s836_s12, 2  ;;  %p1136_p0 = scmp.eq.s32.totalorder %s881_s13, 0 }
  0x17   : > { %s121_s27 = sand.u32 1, %s832_s11   ;;  %s708_s4 = scalar_lea.hbm %s1123_s0, 128 }
  0x18   : > { %p930_p7 = pnand %p654_p2, %p1136_p0  ;;  %p937_p3 = pnand %p667_p4, %p899_p5 }
  0x19   : > { %s502_s29 = sshll.u32 %s121_s27, 9  ;;  %p709_p8 = scmp.ne.s32.totalorder %s1123_s0, %s708_s4 }
  0x1a   : > { %s1138_s28 = scalar_select %p937_p3, 1, 0 }
  0x1b   : > { %p710_p9 = pneg %p930_p7  ;;  %p715_p4 = scmp.lt.u32.totalorder %s708_s4, %s1123_s0 }
  0x1d   : > { %p711_p10 = pnand %p710_p9, %p709_p8 }
  0x1f   : > { %p712_p2 = pneg %p711_p10 }
  0x21   : > { %p717_p5 = pnand %p715_p4, %p712_p2 }
  0x23   : > { %720 = shalt.err (!%p717_p5)
}
  0x24   : > { %s721_s14 = scalar_lea.vmem %s111_s25, 128  ;;  %p729_p11 = scmp.lt.s32.totalorder %s111_s25, %s111_s25 }
  0x25   : > { %p722_p0 = scmp.ne.s32.totalorder %s111_s25, %s721_s14  ;;  %p730_p6 = scmp.lt.s32.totalorder %s721_s14, %s721_s14 }
  0x27   : > { %p724_p1 = pnand %p722_p0, %p710_p9  ;;  %p731_p13 = por %p730_p6, %p729_p11 }
  0x29   : > { %p725_p12 = pneg %p724_p1 }
  0x2b   : > { %p732_p3 = pnand %p731_p13, %p725_p12 }
  0x2d   : > { %735 = shalt.err (!%p732_p3)
}
  0x2e   : > { %657 = dma.hbm_to_vmem [thread:$0]  (!%p930_p7), %s1123_s0, 128, %s111_s25, [#allocation3]  }
  0x2f   : > { %s503_s19 = sshll.u32 %s836_s12, 7  ;;  %s125_s24 = scalar_lea.vmem [#allocation5], %s502_s29 }
  0x30   : > { %s131_s30 = sshll.u32 %s125_s24, 4  ;;  %s961_s5 = scalar_lea.hbm %s1124_s1, %s503_s19  ;;  %s963_s30 = int_to_ptr.vmem [resolvable:$true] %s131_s30 }
  0x31   : > { %s965_s26 = scalar_lea.sflag [#allocation6], %s121_s27  ;;  %s736_s6 = scalar_lea.hbm %s961_s5, 8192 }
  0x32   : > { %p737_p6 = scmp.ne.s32.totalorder %s961_s5, %s736_s6  ;;  %p1139_p11 = scmp.ne.s32.totalorder %s1138_s28, 0 }
  0x33   : > { %s741_s7 = scalar_lea.hbm %s1124_s1, 16384  ;;  %p742_p7 = scmp.lt.u32.totalorder %s961_s5, %s1124_s1 }
  0x34   : > { %p738_p12 = pneg %p1139_p11  ;;  %p743_p3 = scmp.lt.u32.totalorder %s741_s7, %s736_s6 }
  0x35   : > { %p745_p9 = scmp.lt.u32.totalorder %s736_s6, %s961_s5 }
  0x36   : > { %p739_p13 = pnand %p738_p12, %p737_p6  ;;  %p744_p8 = por %p743_p3, %p742_p7 }
  0x38   : > { %p740_p1 = pneg %p739_p13  ;;  %p746_p10 = por %p745_p9, %p744_p8 }
  0x3a   : > { %p747_p2 = pnand %p746_p10, %p740_p1 }
  0x3c   : > { %750 = shalt.err (!%p747_p2)
}
  0x3d   : > { %s751_s27 = scalar_lea.vmem %s963_s30, 8192  ;;  %s839_s16 = smov [#allocation5]  }
  0x3e   : > { %p752_p4 = scmp.ne.s32.totalorder %s963_s30, %s751_s27  ;;  %s756_s17 = sshll.u32 %s839_s16, 4  ;;  %s757_s17 = int_to_ptr.vmem [resolvable:$false] %s756_s17 }
  0x3f   : > { %s758_s19 = scalar_lea.vmem %s757_s17, 16384  ;;  %p759_p6 = scmp.lt.s32.totalorder %s963_s30, %s757_s17 }
  0x40   : > { %p754_p5 = pnand %p752_p4, %p738_p12  ;;  %p760_p13 = scmp.lt.s32.totalorder %s758_s19, %s751_s27 }
  0x42   : > { %p755_p0 = pneg %p754_p5  ;;  %p761_p7 = por %p760_p13, %p759_p6 }
  0x44   : > { %p762_p3 = pnand %p761_p7, %p755_p0 }
  0x46   : > { %765 = shalt.err (!%p762_p3)
}
  0x47   : > { %s840_s24 = smov 256   ;;  %s841_s3 = smov 128  }
  0x48   : > { %s842_s4 = smov 8   ;;  %p1140_p12 = scmp.ne.s32.totalorder %s1135_s23, 0 }
  0x49   : > { %661 = dma.hbm_to_vmem [thread:$0]  (!%p1139_p11), %s961_s5, 8192, %s963_s30, %s965_s26, %s840_s24, %s841_s3, %s842_s4  }
  0x4a   : > { %143 = sbr.rel (%p1140_p12) target bundleno = 354 (0x162), region = 28  ;;  %p1141_p1 = scmp.eq.s32.totalorder (!%p1140_p12), %s881_s13, 0 }
  0x51   : > { %811 = dma.done.wait (%p1141_p1), [#allocation3], 128   ;;  %p1142_p8 = pmov %p1141_p1 }
  0x52   : > { %s1000_s6 = sand.u32 1, %s828_s10   ;;  %p1143_p11 = scmp.ne.s32.totalorder %s1132_s20, 0 }
  0x53   : > { %813 = vsyncadd (%p1142_p8), [#allocation3], 4294967168  ;;  %s506_s25 = sshll.u32 %s1000_s6, 9  ;;  %s150_s29 = scalar_lea.sflag [#allocation6], %s1000_s6 }
  0x54   : > { %s1004_s7 = scalar_lea.vmem [#allocation5], %s506_s25 }
  0x55   : > { %815 = dma.done.wait (%p1143_p11), %s150_s29, 8192  }
  0x56   : > { %817 = vsyncadd (%p1143_p11), %s150_s29, 4294959104  ;;  %v191_v0 = vld [vmem:[%s1004_s7 + $0x80] sm:$0xff]  ;;  %v192_v1 = vld [vmem:[%s1004_s7 + $0x88] sm:$0xff]  ;;  %v843_v47 = vmov 1983009808   ;;  %v244_v49 = vlaneseq  ;;  %s507_s20 = sshll.u32 %s1000_s6, 1 }
  0x57   : > { %v223_v2 = vld [vmem:[%s1004_s7 + $0x180] sm:$0xff]  ;;  %v582_v3 = vpack.c.bf16 %v192_v1, %v191_v0  ;;  %v224_v4 = vld [vmem:[%s1004_s7 + $0x188] sm:$0xff]  ;;  %v193_v11 = vld [vmem:[%s1004_s7 + $0x90] sm:$0xff]  ;;  %v242_v48 = vunpack.c.l.s4 %v843_v47  ;;  %s509_s23 = sshll.u32 %s881_s13, 5  ;;  %s173_s28 = scalar_lea.vmem [#allocation7], %s507_s20 }
  0x58   : > { %v175_v5 = vld [vmem:[%s1004_s7] sm:$0xff]  ;;  %v176_v6 = vld [vmem:[%s1004_s7 + $0x8] sm:$0xff]  ;;  %v614_v7 = vpack.c.bf16 %v224_v4, %v223_v2  ;;  %v194_v13 = vld [vmem:[%s1004_s7 + $0x98] sm:$0xff]  ;;  %v245_v0 = vshrl.u32 %v244_v49, 7  ;;  %s416_s30 = sshll.u32 %s173_s28, 4  ;;  %s1079_s8 = scalar_lea.hbm %s1125_s2, %s509_s23  ;;  %s1081_s30 = int_to_ptr.vmem [resolvable:$true] %s416_s30 }
  0x59   : > { %v584_v8 = vpack.c.bf16 %v176_v6, %v175_v5  ;;  %v207_v9 = vld [vmem:[%s1004_s7 + $0x100] sm:$0xff]  ;;  %v208_v10 = vld [vmem:[%s1004_s7 + $0x108] sm:$0xff]  ;;  %583 = vmatprep.subr.bf16.mxu0 %v582_v3  ;;  %v225_v14 = vld [vmem:[%s1004_s7 + $0x190] sm:$0xff]  ;;  %v586_v16 = vpack.c.bf16 %v194_v13, %v193_v11  ;;  %v243_v63 = vunpack.c.0.s8 %v242_v48  ;;  %s403_s14 = scalar_lea.sflag [#allocation4], %s1000_s6  ;;  %s766_s27 = scalar_lea.vmem %s1081_s30, 32 }
  0x5a   : > { %v616_v12 = vpack.c.bf16 %v208_v10, %v207_v9  ;;  %v226_v15 = vld [vmem:[%s1004_s7 + $0x198] sm:$0xff]  ;;  %615 = vmatprep.subr.bf16.mxu1 %v614_v7  ;;  %v177_v18 = vld [vmem:[%s1004_s7 + $0x10] sm:$0xff]  ;;  %v195_v23 = vld [vmem:[%s1004_s7 + $0xa0] sm:$0xff]  ;;  %p767_p9 = scmp.ne.s32.totalorder %s1081_s30, %s766_s27  ;;  %p1144_p10 = scmp.ne.s32.totalorder %s1133_s21, 0 }
  0x5b   : > { %585 = vmatpush3.bf16.msra.mxu0 %v584_v8  ;;  %v618_v17 = vpack.c.bf16 %v226_v15, %v225_v14  ;;  %v178_v19 = vld [vmem:[%s1004_s7 + $0x18] sm:$0xff]  ;;  %v209_v20 = vld [vmem:[%s1004_s7 + $0x110] sm:$0xff]  ;;  %v196_v24 = vld [vmem:[%s1004_s7 + $0xa8] sm:$0xff]  ;;  %v246_v13 = vsub.s32 %v243_v63, %v245_v0  ;;  %s844_s13 = smov [#allocation7]  }
  0x5c   : > { %617 = vmatpush3.bf16.msra.mxu1 %v616_v12  ;;  %v588_v21 = vpack.c.bf16 %v178_v19, %v177_v18  ;;  %v210_v22 = vld [vmem:[%s1004_s7 + $0x118] sm:$0xff]  ;;  %587 = vmatprep.subr.bf16.mxu0 %v586_v16  ;;  %v590_v26 = vpack.c.bf16 %v196_v24, %v195_v23  ;;  %v227_v27 = vld [vmem:[%s1004_s7 + $0x1a0] sm:$0xff]  ;;  %v228_v28 = vld [vmem:[%s1004_s7 + $0x1a8] sm:$0xff]  ;;  %p768_p2 = pnand %p767_p9, %p1144_p10  ;;  %s770_s16 = sshll.u32 %s844_s13, 4  ;;  %s771_s16 = int_to_ptr.vmem [resolvable:$false] %s770_s16 }
  0x5d   : > { %619 = vmatprep.subr.bf16.mxu1 %v618_v17  ;;  %v620_v25 = vpack.c.bf16 %v210_v22, %v209_v20  ;;  %v179_v29 = vld [vmem:[%s1004_s7 + $0x20] sm:$0xff]  ;;  %v622_v30 = vpack.c.bf16 %v228_v28, %v227_v27  ;;  %v180_v31 = vld [vmem:[%s1004_s7 + $0x28] sm:$0xff]  ;;  %v197_v35 = vld [vmem:[%s1004_s7 + $0xb0] sm:$0xff]  ;;  %s772_s17 = scalar_lea.vmem %s771_s16, 64  ;;  %p773_p5 = scmp.lt.s32.totalorder %s1081_s30, %s771_s16 }
  0x5e   : > { %v211_v32 = vld [vmem:[%s1004_s7 + $0x120] sm:$0xff]  ;;  %v212_v33 = vld [vmem:[%s1004_s7 + $0x128] sm:$0xff]  ;;  %v592_v34 = vpack.c.bf16 %v180_v31, %v179_v29  ;;  %v198_v36 = vld [vmem:[%s1004_s7 + $0xb8] sm:$0xff]  ;;  %p769_p4 = pneg %p768_p2  ;;  %p774_p0 = scmp.lt.s32.totalorder %s772_s17, %s766_s27 }
  0x5f   : > { %589 = vmatpush3.bf16.msra.mxu0 %v588_v21  ;;  %v229_v37 = vld [vmem:[%s1004_s7 + $0x1b0] sm:$0xff]  ;;  %v624_v38 = vpack.c.bf16 %v212_v33, %v211_v32  ;;  %v594_v39 = vpack.c.bf16 %v198_v36, %v197_v35  ;;  %v230_v40 = vld [vmem:[%s1004_s7 + $0x1b8] sm:$0xff]  ;;  %v199_v46 = vld [vmem:[%s1004_s7 + $0xc0] sm:$0xff] }
  0x60   : > { %621 = vmatpush3.bf16.msra.mxu1 %v620_v25  ;;  %591 = vmatprep.subr.bf16.mxu0 %v590_v26  ;;  %v181_v41 = vld [vmem:[%s1004_s7 + $0x30] sm:$0xff]  ;;  %v182_v42 = vld [vmem:[%s1004_s7 + $0x38] sm:$0xff]  ;;  %v626_v43 = vpack.c.bf16 %v230_v40, %v229_v37  ;;  %v200_v50 = vld [vmem:[%s1004_s7 + $0xc8] sm:$0xff]  ;;  %p775_p6 = por %p774_p0, %p773_p5 }
  0x61   : > { %623 = vmatprep.subr.bf16.mxu1 %v622_v30  ;;  %v213_v44 = vld [vmem:[%s1004_s7 + $0x130] sm:$0xff]  ;;  %v214_v45 = vld [vmem:[%s1004_s7 + $0x138] sm:$0xff]  ;;  %v231_v51 = vld [vmem:[%s1004_s7 + $0x1c0] sm:$0xff]  ;;  %v596_v53 = vpack.c.bf16 %v182_v42, %v181_v41  ;;  %v598_v55 = vpack.c.bf16 %v200_v50, %v199_v46 }
  0x62   : > { %v232_v52 = vld [vmem:[%s1004_s7 + $0x1c8] sm:$0xff]  ;;  %v628_v54 = vpack.c.bf16 %v214_v45, %v213_v44  ;;  %v183_v56 = vld [vmem:[%s1004_s7 + $0x40] sm:$0xff]  ;;  %v201_v61 = vld [vmem:[%s1004_s7 + $0xd0] sm:$0xff]  ;;  %p776_p13 = pnand %p775_p6, %p769_p4 }
  0x63   : > { %593 = vmatpush3.bf16.msra.mxu0 %v592_v34  ;;  %v184_v57 = vld [vmem:[%s1004_s7 + $0x48] sm:$0xff]  ;;  %v215_v58 = vld [vmem:[%s1004_s7 + $0x140] sm:$0xff]  ;;  %v630_v59 = vpack.c.bf16 %v232_v52, %v231_v51  ;;  %v202_v62 = vld [vmem:[%s1004_s7 + $0xd8] sm:$0xff] }
  0x64   : > { %625 = vmatpush3.bf16.msra.mxu1 %v624_v38  ;;  %595 = vmatprep.subr.bf16.mxu0 %v594_v39  ;;  %v216_v60 = vld [vmem:[%s1004_s7 + $0x148] sm:$0xff]  ;;  %v233_v1 = vld [vmem:[%s1004_s7 + $0x1d0] sm:$0xff]  ;;  %v234_v2 = vld [vmem:[%s1004_s7 + $0x1d8] sm:$0xff]  ;;  %v600_v3 = vpack.c.bf16 %v184_v57, %v183_v56  ;;  %v602_v5 = vpack.c.bf16 %v202_v62, %v201_v61 }
  0x65   : > { %627 = vmatprep.subr.bf16.mxu1 %v626_v43  ;;  %v632_v4 = vpack.c.bf16 %v216_v60, %v215_v58  ;;  %v185_v6 = vld [vmem:[%s1004_s7 + $0x50] sm:$0xff]  ;;  %v186_v7 = vld [vmem:[%s1004_s7 + $0x58] sm:$0xff]  ;;  %v634_v9 = vpack.c.bf16 %v234_v2, %v233_v1  ;;  %v203_v11 = vld [vmem:[%s1004_s7 + $0xe0] sm:$0xff] }
  0x66   : > { %v217_v8 = vld [vmem:[%s1004_s7 + $0x150] sm:$0xff]  ;;  %v218_v10 = vld [vmem:[%s1004_s7 + $0x158] sm:$0xff]  ;;  %v204_v12 = vld [vmem:[%s1004_s7 + $0xe8] sm:$0xff]  ;;  %v604_v16 = vpack.c.bf16 %v186_v7, %v185_v6 }
  0x67   : > { %597 = vmatpush3.bf16.msra.mxu0 %v596_v53  ;;  %v235_v14 = vld [vmem:[%s1004_s7 + $0x1e0] sm:$0xff]  ;;  %v236_v15 = vld [vmem:[%s1004_s7 + $0x1e8] sm:$0xff]  ;;  %v636_v18 = vpack.c.bf16 %v218_v10, %v217_v8  ;;  %v606_v19 = vpack.c.bf16 %v204_v12, %v203_v11  ;;  %v174_v22 = vld [vmem:[#allocation2] sm:$0xff] }
  0x68   : > { %629 = vmatpush3.bf16.msra.mxu1 %v628_v54  ;;  %599 = vmatprep.subr.bf16.mxu0 %v598_v55  ;;  %v187_v17 = vld [vmem:[%s1004_s7 + $0x60] sm:$0xff]  ;;  %v188_v20 = vld [vmem:[%s1004_s7 + $0x68] sm:$0xff]  ;;  %v638_v23 = vpack.c.bf16 %v236_v15, %v235_v14  ;;  %v205_v25 = vld [vmem:[%s1004_s7 + $0xf0] sm:$0xff]  ;;  %v247_v27 = vrot.slane %v174_v22, %v246_v13  ;;  %v240_v28 = vcombine.high %v174_v22, %v174_v22 }
  0x69   : > { %631 = vmatprep.subr.bf16.mxu1 %v630_v59  ;;  %v219_v21 = vld [vmem:[%s1004_s7 + $0x160] sm:$0xff]  ;;  %v220_v24 = vld [vmem:[%s1004_s7 + $0x168] sm:$0xff]  ;;  %v206_v26 = vld [vmem:[%s1004_s7 + $0xf8] sm:$0xff]  ;;  %v608_v31 = vpack.c.bf16 %v188_v20, %v187_v17 }
  0x6a   : > { %v237_v29 = vld [vmem:[%s1004_s7 + $0x1f0] sm:$0xff]  ;;  %v238_v30 = vld [vmem:[%s1004_s7 + $0x1f8] sm:$0xff]  ;;  %v255_v32 = vcombine.high %v247_v27, %v247_v27  ;;  %v254_v33 = vrot.slane %v240_v28, %v246_v13  ;;  %v640_v34 = vpack.c.bf16 %v220_v24, %v219_v21  ;;  %v610_v35 = vpack.c.bf16 %v206_v26, %v205_v25 }
  0x6b   : > { %601 = vmatpush3.bf16.msra.mxu0 %v600_v3  ;;  %v189_v36 = vld [vmem:[%s1004_s7 + $0x70] sm:$0xff]  ;;  %v190_v37 = vld [vmem:[%s1004_s7 + $0x78] sm:$0xff]  ;;  %v642_v38 = vpack.c.bf16 %v238_v30, %v237_v29 }
  0x6c   : > { %633 = vmatpush3.bf16.msra.mxu1 %v632_v4  ;;  %603 = vmatprep.subr.bf16.mxu0 %v602_v5  ;;  %v221_v39 = vld [vmem:[%s1004_s7 + $0x170] sm:$0xff]  ;;  %v222_v40 = vld [vmem:[%s1004_s7 + $0x178] sm:$0xff]  ;;  %v256_v41 = vcombine.high %v254_v33, %v254_v33  ;;  %v612_v42 = vpack.c.bf16 %v190_v37, %v189_v36 }
  0x6d   : > { %635 = vmatprep.subr.bf16.mxu1 %v634_v9  ;;  %325 = vmatprep.mubr.f32.mxu0 %v255_v32  ;;  %v644_v43 = vpack.c.bf16 %v222_v40, %v221_v39 }
  0x6e   : > { %395 = vmatprep.mubr.f32.mxu1 %v256_v41 }
  0x6f   : > { %605 = vmatpush3.bf16.msra.mxu0 %v604_v16 }
  0x70   : > { %637 = vmatpush3.bf16.msra.mxu1 %v636_v18  ;;  %607 = vmatprep.subr.bf16.mxu0 %v606_v19 }
  0x71   : > { %639 = vmatprep.subr.bf16.mxu1 %v638_v23 }
  0x73   : > { %609 = vmatpush3.bf16.msra.mxu0 %v608_v31 }
  0x74   : > { %641 = vmatpush3.bf16.msra.mxu1 %v640_v34  ;;  %611 = vmatprep.subr.bf16.mxu0 %v610_v35 }
  0x75   : > { %643 = vmatprep.subr.bf16.mxu1 %v642_v38 }
  0x77   : > { %613 = vmatpush3.bf16.msra.mxu0 %v612_v42 }
  0x78   : > { %645 = vmatpush3.bf16.msra.mxu1 %v644_v43 }
  0x7a   : > { %326 = vmatmul.mubr.f32.vlgmr.msra.gmra.mrb[0].mxu0 %v247_v27 }
  0x7b   : > { %396 = vmatmul.mubr.f32.vlgmr.msra.gmra.mrb[0].mxu1 %v254_v33 }
 0x14d   : > { %v544_v44 = vpop.f32.mrb[0].mxu0 }
 0x14e   : > { %v579_v45 = vpop.f32.mrb[0].mxu1  ;;  %v545_v46 = vpop.f32.mrb[1].mxu0 }
 0x14f   : > { %v546_v47 = vadd.f32 %v545_v46, %v544_v44  ;;  %v580_v48 = vpop.f32.mrb[1].mxu1 }
 0x150   : > { %v581_v49 = vadd.f32 %v580_v48, %v579_v45 }
 0x152   : > { %v398_v50 = vadd.f32 %v581_v49, %v546_v47 }
 0x154   : > { %401 = vst [vmem:[%s173_s28] sm:$0x3] %v398_v50 }
 0x155   : > { %779 = shalt.err (!%p776_p13)
}
 0x156   : > { %s780_s19 = scalar_lea.hbm %s1079_s8, 32  ;;  %s784_s4 = scalar_lea.hbm %s1125_s2, 64 }
 0x157   : > { %p781_p7 = scmp.ne.s32.totalorder %s1079_s8, %s780_s19  ;;  %p785_p1 = scmp.lt.u32.totalorder %s1079_s8, %s1125_s2 }
 0x158   : > { %p786_p8 = scmp.lt.u32.totalorder %s784_s4, %s780_s19  ;;  %p788_p9 = scmp.lt.u32.totalorder %s780_s19, %s1079_s8 }
 0x159   : > { %p782_p3 = pnand %p781_p7, %p1144_p10 }
 0x15a   : > { %p787_p11 = por %p786_p8, %p785_p1 }
 0x15b   : > { %p783_p12 = pneg %p782_p3 }
 0x15c   : > { %p789_p2 = por %p788_p9, %p787_p11 }
 0x15e   : > { %p790_p4 = pnand %p789_p2, %p783_p12 }
 0x160   : > { %793 = shalt.err (!%p790_p4)
}
 0x161   : > { %652 = dma.vmem_to_hbm [thread:$0]  (%p1144_p10), %s1081_s30, 32, %s1079_s8, %s403_s14  }
 0x162 PF: > { %s428_s29 = sand.u32 1, %s824_s9   ;;  %p1145_p5 = scmp.ne.s32.totalorder %s1134_s22, 0 }
 0x163   : > { %p1146_p0 = scmp.ge.s32.totalorder %s836_s12, 2  ;;  %s429_s7 = scalar_lea.sflag [#allocation4], %s428_s29 }
 0x165   : > { %p663_p6 = pnand %p1146_p0, %p1145_p5 }
 0x167   : > { %819 = dma.done.wait (!%p663_p6), %s429_s7, 32  }
 0x168   : > { %821 = vsyncadd (!%p663_p6), %s429_s7, 4294967264  ;;  %p16_p13 = scmp.ge.s32.totalorder %s885_s15, 4   ;;  %s1147_s9 = smov %s828_s10 }
 0x169   : > { %s1148_s10 = smov %s832_s11  ;;  %s1149_s11 = smov %s897_s18 }
 0x16a   : > { %s1150_s12 = smov %s885_s15  ;;  %18 = sbr.rel (!%p16_p13) target bundleno = 6 (0x6), region = 78 }
 0x171   :  { %434 = vsyncpa [#allocation3], 1 }
 0x172   :  { %436 = vsyncpa [#allocation3 + $0x1], 1 }
 0x173   :  { %437 = vsyncpa [#allocation6], 1 }
 0x174   :  { %439 = vsyncpa [#allocation6 + $0x1], 1 }
 0x175   :  { %440 = vsyncpa [#allocation4], 1 }
 0x176   :  { %442 = vsyncpa [#allocation4 + $0x1], 1 }

</bundles_post_ra>
